<compile_context>
chip_gen: v7x
topology: tpu7x:2x2x1
jax: 0.10.0
libtpu: 0.0.40
codegen_flags: <defaults>
</compile_context>

<pallas_src>
import functools

import jax
import jax.numpy as jnp
from jax import lax
from jax.experimental import pallas as pl
from jax.experimental.pallas import tpu as pltpu


def _loss_kernel(logits_ref, labels_ref, ce_ref, cont_ref, p_prev_ref,
                 *, C, D, Td, Tn):
    """One grid step: up to Td depth slices of one (batch, pixel-tile) block.

    Grid = (B, N_pad // Tn, cdiv(D, Td)).  NOTE: depth MUST remain the
    innermost / 'arbitrary' grid axis — the p_prev carry and the dc == 0
    accumulator init rely on the depth sweep being sequential per
    (batch, pixel-tile).

    logits_ref : (Td, C, Tn)  channel-on-sublane, pixel-on-lane
    labels_ref : (Td, 1, Tn)  int32 class ids (-1 on padded pixels)
    ce_ref     : (1, Tn)      partial sums of -log p[label]   (class-reduced)
    cont_ref   : (1, Tn)      partial sums of sum_c |p_d - p_{d-1}|
    p_prev_ref : (C, Tn)      softmax of the last processed depth slice;
                              read/written only at chunk boundaries.
    """
    dc = pl.program_id(2)
    n_dchunks = pl.num_programs(2)

    @pl.when(dc == 0)
    def _init():
        ce_ref[...] = jnp.zeros_like(ce_ref)
        cont_ref[...] = jnp.zeros_like(cont_ref)

    # Loop-invariant class-index plane (hoisted: JAX does not CSE broadcasts).
    cls = lax.broadcasted_iota(jnp.int32, (C, Tn), 0)

    def run_chunk(n_slices):
        def body(t, p_prev):
            d_global = dc * Td + t
            x = logits_ref[t].astype(jnp.float32)            # (C, Tn)
            lbl = labels_ref[t]                              # (1, Tn) int32

            # Softmax over the (sublane) class axis — one exp per element.
            m = jnp.max(x, axis=0, keepdims=True)            # (1, Tn)   XLU
            ex = jnp.exp(x - m)                              # EUP
            denom = jnp.sum(ex, axis=0, keepdims=True)       # (1, Tn)   XLU
            p = ex * pl.reciprocal(denom, approx=True)       # EUP rcp

            # CE without materializing log-softmax:
            #   -log p[label] = sum_c [cls==label] * ((m + log denom) - x_c)
            # Padded pixels have label -1 -> select nothing (no mask needed).
            log_z = m + jnp.log(denom)
            nll = jnp.where(cls == lbl, log_z - x, 0.0)      # (C, Tn) select
            ce_ref[...] += jnp.sum(nll, axis=0, keepdims=True)

            # Depth continuity against the previous slice (register carry).
            @pl.when(d_global > 0)
            def _cont():
                diff = jnp.abs(p - p_prev)
                cont_ref[...] += jnp.sum(diff, axis=0, keepdims=True)

            return p

        p0 = p_prev_ref[...]                  # chunk-boundary read only
        unroll = True if n_slices <= 8 else 4
        p_last = lax.fori_loop(0, n_slices, body, p0, unroll=unroll)
        p_prev_ref[...] = p_last              # chunk-boundary write only

    rem = D % Td  # static
    if rem == 0:
        run_chunk(Td)
    else:
        # cdiv(D, Td) depth chunks; the final one has a statically-shorter
        # trip count, so out-of-bounds rows of the block are never touched.
        @pl.when(dc < n_dchunks - 1)
        def _full():
            run_chunk(Td)

        @pl.when(dc == n_dchunks - 1)
        def _tail():
            run_chunk(rem)


def _vmem_limit_bytes():
    """Scoped-VMEM budget: generous on v5e/v6e (128 MiB physical VMEM),
    safe on v7x (64 MiB physical)."""
    try:
        cap = int(pltpu.get_tpu_info().vmem_capacity_bytes)
    except Exception:
        cap = 64 * 1024 * 1024  # conservative: assume v7x
    return int(min(cap * 3 // 4, 96 * 1024 * 1024))


def _loss_sums_cs(lg, lb):
    """Channel-on-sublane entry point.

    lg : (B, D, C, N_pad) logits (any float dtype; bf16 recommended on v5e)
    lb : (B, D, 1, N_pad) int32 labels, -1 on padded pixels
    Returns (sum of per-voxel CE, sum over adjacent-depth |softmax diff|).
    """
    B, D, C, N_pad = lg.shape
    assert N_pad % 128 == 0, "pixel axis must be lane-aligned (pad to 128)"

    itemsize = jnp.dtype(lg.dtype).itemsize

    # Pixel tile: largest multiple of 128 dividing N_pad, capped so a (C, Tn)
    # f32 plane stays within a few vregs (keeps the p_prev register carry and
    # the working set small on v7x).
    TN_CAP = 1024
    if N_pad <= TN_CAP:
        Tn = N_pad
    else:
        Tn = max(t for t in range(128, TN_CAP + 1, 128) if N_pad % t == 0)

    # VMEM accounting: double-buffered inputs + double-buffered (1, Tn)
    # accumulator blocks + the (C, Tn) p_prev scratch.
    vmem_limit = _vmem_limit_bytes()
    budget = max(8 * 1024 * 1024, vmem_limit - 8 * 1024 * 1024)
    in_bytes_per_slice = C * Tn * itemsize + Tn * 4
    fixed_bytes = 2 * (2 * Tn * 4) + C * Tn * 4
    Td = int(max(1, min(D, (budget - fixed_bytes) // (2 * in_bytes_per_slice))))

    n_dchunks = pl.cdiv(D, Td)
    grid = (B, N_pad // Tn, n_dchunks)

    kernel = functools.partial(_loss_kernel, C=C, D=D, Td=Td, Tn=Tn)

    cost = pl.CostEstimate(
        flops=int(12 * B * D * C * N_pad),
        transcendentals=int(B * D * N_pad * (C + 2)),   # exp + log + rcp
        bytes_accessed=int(lg.size * itemsize + lb.size * 4 + 2 * B * N_pad * 4),
    )

    ce_part, cont_part = pl.pallas_call(
        kernel,
        out_shape=(jax.ShapeDtypeStruct((B, 1, N_pad), jnp.float32),
                   jax.ShapeDtypeStruct((B, 1, N_pad), jnp.float32)),
        grid_spec=pltpu.PrefetchScalarGridSpec(
            num_scalar_prefetch=0,
            grid=grid,
            in_specs=[
                pl.BlockSpec((None, Td, C, Tn), lambda b, n, dc: (b, dc, 0, n)),
                pl.BlockSpec((None, Td, 1, Tn), lambda b, n, dc: (b, dc, 0, n)),
            ],
            out_specs=[
                pl.BlockSpec((None, 1, Tn), lambda b, n, dc: (b, 0, n)),
                pl.BlockSpec((None, 1, Tn), lambda b, n, dc: (b, 0, n)),
            ],
            scratch_shapes=[pltpu.VMEM((C, Tn), jnp.float32)],
        ),
        compiler_params=pltpu.CompilerParams(
            # Batch and pixel tiles shard across TensorCores; depth is the
            # sequential accumulation axis and must stay last / 'arbitrary'.
            dimension_semantics=("parallel", "parallel", "arbitrary"),
            vmem_limit_bytes=int(vmem_limit),
        ),
        cost_estimate=cost,
    )(lg, lb)

    return jnp.sum(ce_part), jnp.sum(cont_part)


def cont_loss_forward(logits, labels, w_alpha, w_beta,
                      min_alpha=0.6, min_beta=0.3, reg_lambda=0.01):
    """Pallas-backed ContLoss.forward.

    The module's injected `cross_entropy_loss` is realized as softmax
    cross-entropy with integer labels (class axis last, mean reduction).
    Note: D == 1 makes the continuity mean a 0/0 (NaN) — same as PyTorch's
    mean over an empty tensor.
    """
    B, D, H, W, C = logits.shape
    N = H * W

    # TODO(synk): produce logits/labels in channel-on-sublane (B, D, C, H*W)
    # layout upstream so this transpose (a full extra HBM pass) disappears;
    # _loss_sums_cs accepts that layout directly.
    lg = jnp.transpose(logits.reshape(B, D, N, C), (0, 1, 3, 2))   # (B, D, C, N)
    lb = labels.reshape(B, D, 1, N).astype(jnp.int32)              # (B, D, 1, N)

    N_pad = -(-N // 128) * 128
    if N_pad != N:  # only pad when H*W is not already lane-aligned
        pad = N_pad - N
        # Padded logits are constant (0) across depth -> softmax diff is
        # exactly 0; padded labels are -1 -> they select no class in the CE.
        lg = jnp.pad(lg, ((0, 0), (0, 0), (0, 0), (0, pad)))
        lb = jnp.pad(lb, ((0, 0), (0, 0), (0, 0), (0, pad)), constant_values=-1)

    ce_sum, cont_sum = _loss_sums_cs(lg, lb)

    ce_loss = ce_sum / jnp.float32(B * D * H * W)
    cont_loss = cont_sum / jnp.float32(B * (D - 1) * H * W * C)

    variable_weight = 1.0 - min_alpha - min_beta
    scaled_alpha = jax.nn.sigmoid(w_alpha)
    scaled_beta = jax.nn.sigmoid(w_beta)
    weight_sum = scaled_alpha + scaled_beta + 1e-6
    alpha = min_alpha + variable_weight * (scaled_alpha / weight_sum)
    beta = min_beta + variable_weight * (scaled_beta / weight_sum)

    total_loss = alpha * ce_loss + beta * cont_loss
    total_loss = total_loss + reg_lambda * (w_alpha ** 2 + w_beta ** 2)
    return total_loss


def _reference(logits, labels, w_alpha, w_beta,
               min_alpha=0.6, min_beta=0.3, reg_lambda=0.01):
    """Pure-JAX reference for validation."""
    logp = jax.nn.log_softmax(logits.astype(jnp.float32), axis=-1)
    ce = -jnp.mean(jnp.take_along_axis(logp, labels[..., None], axis=-1))
    p = jax.nn.softmax(logits.astype(jnp.float32), axis=-1)
    cont = jnp.mean(jnp.abs(p[:, :-1] - p[:, 1:]))
    variable_weight = 1.0 - min_alpha - min_beta
    sa = jax.nn.sigmoid(w_alpha); sb = jax.nn.sigmoid(w_beta)
    ws = sa + sb + 1e-6
    alpha = min_alpha + variable_weight * (sa / ws)
    beta = min_beta + variable_weight * (sb / ws)
    return alpha * ce + beta * cont + reg_lambda * (w_alpha ** 2 + w_beta ** 2)


if __name__ == "__main__":
    key = jax.random.PRNGKey(0)
    k1, k2 = jax.random.split(key)

    B, D, H, W, C = 2, 4, 8, 16, 8
    logits = jax.random.normal(k1, (B, D, H, W, C), dtype=jnp.float32)
    labels = jax.random.randint(k2, (B, D, H, W), 0, C, dtype=jnp.int32)

    # Deterministic parameter init, matching nn.Parameter(torch.tensor(0.0)).
    w_alpha = jnp.float32(0.0)
    w_beta = jnp.float32(0.0)

    total = jax.jit(cont_loss_forward)(logits, labels, w_alpha, w_beta)
    total = jax.block_until_ready(total)

    ref = _reference(logits, labels, w_alpha, w_beta)
    # Tolerance covers the approximate EUP reciprocal used for the softmax of
    # the (small) continuity term; the cross-entropy path is exact.
    assert jnp.allclose(total, ref, rtol=2e-4, atol=2e-4), (total, ref)

    print("KERNEL_OK")
</pallas_src>

<mosaic_0001>
module attributes {stable_mosaic.version = 11 : i64} {
  func.func @_loss_kernel(%arg0: i32, %arg1: i32, %arg2: i32, %arg3: memref<1x4x8x128xf32, #tpu.memory_space<vmem>>, %arg4: memref<1x4x1x128xi32, #tpu.memory_space<vmem>>, %arg5: memref<1x1x128xf32, #tpu.memory_space<vmem>>, %arg6: memref<1x1x128xf32, #tpu.memory_space<vmem>>, %arg7: memref<8x128xf32, #tpu.memory_space<vmem>>) attributes {dimension_semantics = [#tpu.dimension_semantics<parallel>, #tpu.dimension_semantics<parallel>, #tpu.dimension_semantics<arbitrary>], iteration_bounds = array<i64: 2, 1, 1>, scalar_prefetch = 0 : i64, scratch_operands = 1 : i64, tpu.core_type = #tpu.core_type<tc>, window_params = [{transform_indices = @transform_0, window_bounds = array<i64: 1, 4, 8, 128>}, {transform_indices = @transform_1, window_bounds = array<i64: 1, 4, 1, 128>}, {transform_indices = @transform_2, window_bounds = array<i64: 1, 1, 128>}, {transform_indices = @transform_3, window_bounds = array<i64: 1, 1, 128>}]} {
    %c0_i32 = arith.constant 0 : i32
    %0 = arith.cmpi eq, %arg2, %c0_i32 : i32
    %1 = arith.extui %0 : i1 to i32
    %c0_i32_0 = arith.constant 0 : i32
    %2 = arith.cmpi ne, %1, %c0_i32_0 : i32
    scf.if %2 {
      %cst_80 = arith.constant 0.000000e+00 : f32
      %154 = vector.broadcast %cst_80 : f32 to vector<1x128xf32>
      %c0_81 = arith.constant 0 : index
      %c0_82 = arith.constant 0 : index
      %c0_83 = arith.constant 0 : index
      %155 = vector.load %arg5[%c0_81, %c0_82, %c0_83] : memref<1x1x128xf32, #tpu.memory_space<vmem>>, vector<1x1x128xf32>
      %156 = vector.shape_cast %155 : vector<1x1x128xf32> to vector<1x128xf32>
      %157 = vector.shape_cast %154 : vector<1x128xf32> to vector<1x1x128xf32>
      tpu.vector_store %arg5[%c0_81, %c0_82, %c0_83], %157 {strides = array<i32>} : memref<1x1x128xf32, #tpu.memory_space<vmem>>, vector<1x1x128xf32>,
      %cst_84 = arith.constant 0.000000e+00 : f32
      %158 = vector.broadcast %cst_84 : f32 to vector<1x128xf32>
      %c0_85 = arith.constant 0 : index
      %c0_86 = arith.constant 0 : index
      %c0_87 = arith.constant 0 : index
      %159 = vector.load %arg6[%c0_85, %c0_86, %c0_87] : memref<1x1x128xf32, #tpu.memory_space<vmem>>, vector<1x1x128xf32>
      %160 = vector.shape_cast %159 : vector<1x1x128xf32> to vector<1x128xf32>
      %161 = vector.shape_cast %158 : vector<1x128xf32> to vector<1x1x128xf32>
      tpu.vector_store %arg6[%c0_85, %c0_86, %c0_87], %161 {strides = array<i32>} : memref<1x1x128xf32, #tpu.memory_space<vmem>>, vector<1x1x128xf32>,
    } else {
    }
    %3 = tpu.iota {dimensions = array<i32: 0>} : vector<8x128xi32>
    %c0 = arith.constant 0 : index
    %c0_1 = arith.constant 0 : index
    %4 = vector.load %arg7[%c0, %c0_1] : memref<8x128xf32, #tpu.memory_space<vmem>>, vector<8x128xf32>
    %c0_i32_2 = arith.constant 0 : i32
    %c4_i32 = arith.constant 4 : i32
    %5 = arith.muli %arg2, %c4_i32 : i32
    %6 = arith.addi %5, %c0_i32_2 : i32
    %c0_3 = arith.constant 0 : index
    %7 = arith.index_cast %c0_i32_2 : i32 to index
    %c0_4 = arith.constant 0 : index
    %c0_5 = arith.constant 0 : index
    %8 = vector.load %arg3[%c0_3, %7, %c0_4, %c0_5] : memref<1x4x8x128xf32, #tpu.memory_space<vmem>>, vector<1x1x8x128xf32>
    %9 = vector.shape_cast %8 : vector<1x1x8x128xf32> to vector<8x128xf32>
    %c0_6 = arith.constant 0 : index
    %10 = arith.index_cast %c0_i32_2 : i32 to index
    %c0_7 = arith.constant 0 : index
    %c0_8 = arith.constant 0 : index
    %11 = vector.load %arg4[%c0_6, %10, %c0_7, %c0_8] : memref<1x4x1x128xi32, #tpu.memory_space<vmem>>, vector<1x1x1x128xi32>
    %12 = vector.shape_cast %11 : vector<1x1x1x128xi32> to vector<1x128xi32>
    %cst = arith.constant dense<0xFF800000> : vector<128xf32>
    %13 = vector.multi_reduction <maximumf>, %9, %cst [0] : vector<8x128xf32> to vector<128xf32>
    %14 = vector.shape_cast %13 : vector<128xf32> to vector<1x128xf32>
    %15 = vector.broadcast %14 : vector<1x128xf32> to vector<8x128xf32>
    %16 = arith.subf %9, %15 : vector<8x128xf32>
    %17 = math.exp %16 : vector<8x128xf32>
    %cst_9 = arith.constant dense<0.000000e+00> : vector<128xf32>
    %18 = vector.multi_reduction <add>, %17, %cst_9 [0] : vector<8x128xf32> to vector<128xf32>
    %19 = vector.shape_cast %18 : vector<128xf32> to vector<1x128xf32>
    %20 = tpu.reciprocal %19 {approx = true} : vector<1x128xf32> -> vector<1x128xf32>
    %21 = vector.broadcast %20 : vector<1x128xf32> to vector<8x128xf32>
    %22 = arith.mulf %17, %21 : vector<8x128xf32>
    %23 = math.log %19 : vector<1x128xf32>
    %24 = arith.addf %14, %23 : vector<1x128xf32>
    %25 = vector.broadcast %12 : vector<1x128xi32> to vector<8x128xi32>
    %26 = arith.cmpi eq, %3, %25 : vector<8x128xi32>
    %27 = vector.broadcast %24 : vector<1x128xf32> to vector<8x128xf32>
    %28 = arith.subf %27, %9 : vector<8x128xf32>
    %cst_10 = arith.constant 0.000000e+00 : f32
    %29 = vector.broadcast %cst_10 : f32 to vector<8x128xf32>
    %30 = arith.select %26, %28, %29 : vector<8x128xi1>, vector<8x128xf32>
    %c0_11 = arith.constant 0 : index
    %c0_12 = arith.constant 0 : index
    %c0_13 = arith.constant 0 : index
    %31 = vector.load %arg5[%c0_11, %c0_12, %c0_13] : memref<1x1x128xf32, #tpu.memory_space<vmem>>, vector<1x1x128xf32>
    %32 = vector.shape_cast %31 : vector<1x1x128xf32> to vector<1x128xf32>
    %cst_14 = arith.constant dense<0.000000e+00> : vector<128xf32>
    %33 = vector.multi_reduction <add>, %30, %cst_14 [0] : vector<8x128xf32> to vector<128xf32>
    %34 = vector.shape_cast %33 : vector<128xf32> to vector<1x128xf32>
    %35 = arith.addf %32, %34 : vector<1x128xf32>
    %c0_15 = arith.constant 0 : index
    %c0_16 = arith.constant 0 : index
    %c0_17 = arith.constant 0 : index
    %36 = vector.load %arg5[%c0_15, %c0_16, %c0_17] : memref<1x1x128xf32, #tpu.memory_space<vmem>>, vector<1x1x128xf32>
    %37 = vector.shape_cast %36 : vector<1x1x128xf32> to vector<1x128xf32>
    %38 = vector.shape_cast %35 : vector<1x128xf32> to vector<1x1x128xf32>
    tpu.vector_store %arg5[%c0_15, %c0_16, %c0_17], %38 {strides = array<i32>} : memref<1x1x128xf32, #tpu.memory_space<vmem>>, vector<1x1x128xf32>,
    %c0_i32_18 = arith.constant 0 : i32
    %39 = arith.cmpi sgt, %6, %c0_i32_18 : i32
    %40 = arith.extui %39 : i1 to i32
    %c0_i32_19 = arith.constant 0 : i32
    %41 = arith.cmpi ne, %40, %c0_i32_19 : i32
    scf.if %41 {
      %154 = arith.subf %22, %4 : vector<8x128xf32>
      %155 = math.absf %154 : vector<8x128xf32>
      %c0_80 = arith.constant 0 : index
      %c0_81 = arith.constant 0 : index
      %c0_82 = arith.constant 0 : index
      %156 = vector.load %arg6[%c0_80, %c0_81, %c0_82] : memref<1x1x128xf32, #tpu.memory_space<vmem>>, vector<1x1x128xf32>
      %157 = vector.shape_cast %156 : vector<1x1x128xf32> to vector<1x128xf32>
      %cst_83 = arith.constant dense<0.000000e+00> : vector<128xf32>
      %158 = vector.multi_reduction <add>, %155, %cst_83 [0] : vector<8x128xf32> to vector<128xf32>
      %159 = vector.shape_cast %158 : vector<128xf32> to vector<1x128xf32>
      %160 = arith.addf %157, %159 : vector<1x128xf32>
      %c0_84 = arith.constant 0 : index
      %c0_85 = arith.constant 0 : index
      %c0_86 = arith.constant 0 : index
      %161 = vector.load %arg6[%c0_84, %c0_85, %c0_86] : memref<1x1x128xf32, #tpu.memory_space<vmem>>, vector<1x1x128xf32>
      %162 = vector.shape_cast %161 : vector<1x1x128xf32> to vector<1x128xf32>
      %163 = vector.shape_cast %160 : vector<1x128xf32> to vector<1x1x128xf32>
      tpu.vector_store %arg6[%c0_84, %c0_85, %c0_86], %163 {strides = array<i32>} : memref<1x1x128xf32, #tpu.memory_space<vmem>>, vector<1x1x128xf32>,
    } else {
    }
    %c1_i32 = arith.constant 1 : i32
    %c4_i32_20 = arith.constant 4 : i32
    %42 = arith.muli %arg2, %c4_i32_20 : i32
    %43 = arith.addi %42, %c1_i32 : i32
    %c0_21 = arith.constant 0 : index
    %44 = arith.index_cast %c1_i32 : i32 to index
    %c0_22 = arith.constant 0 : index
    %c0_23 = arith.constant 0 : index
    %45 = vector.load %arg3[%c0_21, %44, %c0_22, %c0_23] : memref<1x4x8x128xf32, #tpu.memory_space<vmem>>, vector<1x1x8x128xf32>
    %46 = vector.shape_cast %45 : vector<1x1x8x128xf32> to vector<8x128xf32>
    %c0_24 = arith.constant 0 : index
    %47 = arith.index_cast %c1_i32 : i32 to index
    %c0_25 = arith.constant 0 : index
    %c0_26 = arith.constant 0 : index
    %48 = vector.load %arg4[%c0_24, %47, %c0_25, %c0_26] : memref<1x4x1x128xi32, #tpu.memory_space<vmem>>, vector<1x1x1x128xi32>
    %49 = vector.shape_cast %48 : vector<1x1x1x128xi32> to vector<1x128xi32>
    %cst_27 = arith.constant dense<0xFF800000> : vector<128xf32>
    %50 = vector.multi_reduction <maximumf>, %46, %cst_27 [0] : vector<8x128xf32> to vector<128xf32>
    %51 = vector.shape_cast %50 : vector<128xf32> to vector<1x128xf32>
    %52 = vector.broadcast %51 : vector<1x128xf32> to vector<8x128xf32>
    %53 = arith.subf %46, %52 : vector<8x128xf32>
    %54 = math.exp %53 : vector<8x128xf32>
    %cst_28 = arith.constant dense<0.000000e+00> : vector<128xf32>
    %55 = vector.multi_reduction <add>, %54, %cst_28 [0] : vector<8x128xf32> to vector<128xf32>
    %56 = vector.shape_cast %55 : vector<128xf32> to vector<1x128xf32>
    %57 = tpu.reciprocal %56 {approx = true} : vector<1x128xf32> -> vector<1x128xf32>
    %58 = vector.broadcast %57 : vector<1x128xf32> to vector<8x128xf32>
    %59 = arith.mulf %54, %58 : vector<8x128xf32>
    %60 = math.log %56 : vector<1x128xf32>
    %61 = arith.addf %51, %60 : vector<1x128xf32>
    %62 = vector.broadcast %49 : vector<1x128xi32> to vector<8x128xi32>
    %63 = arith.cmpi eq, %3, %62 : vector<8x128xi32>
    %64 = vector.broadcast %61 : vector<1x128xf32> to vector<8x128xf32>
    %65 = arith.subf %64, %46 : vector<8x128xf32>
    %cst_29 = arith.constant 0.000000e+00 : f32
    %66 = vector.broadcast %cst_29 : f32 to vector<8x128xf32>
    %67 = arith.select %63, %65, %66 : vector<8x128xi1>, vector<8x128xf32>
    %c0_30 = arith.constant 0 : index
    %c0_31 = arith.constant 0 : index
    %c0_32 = arith.constant 0 : index
    %68 = vector.load %arg5[%c0_30, %c0_31, %c0_32] : memref<1x1x128xf32, #tpu.memory_space<vmem>>, vector<1x1x128xf32>
    %69 = vector.shape_cast %68 : vector<1x1x128xf32> to vector<1x128xf32>
    %cst_33 = arith.constant dense<0.000000e+00> : vector<128xf32>
    %70 = vector.multi_reduction <add>, %67, %cst_33 [0] : vector<8x128xf32> to vector<128xf32>
    %71 = vector.shape_cast %70 : vector<128xf32> to vector<1x128xf32>
    %72 = arith.addf %69, %71 : vector<1x128xf32>
    %c0_34 = arith.constant 0 : index
    %c0_35 = arith.constant 0 : index
    %c0_36 = arith.constant 0 : index
    %73 = vector.load %arg5[%c0_34, %c0_35, %c0_36] : memref<1x1x128xf32, #tpu.memory_space<vmem>>, vector<1x1x128xf32>
    %74 = vector.shape_cast %73 : vector<1x1x128xf32> to vector<1x128xf32>
    %75 = vector.shape_cast %72 : vector<1x128xf32> to vector<1x1x128xf32>
    tpu.vector_store %arg5[%c0_34, %c0_35, %c0_36], %75 {strides = array<i32>} : memref<1x1x128xf32, #tpu.memory_space<vmem>>, vector<1x1x128xf32>,
    %c0_i32_37 = arith.constant 0 : i32
    %76 = arith.cmpi sgt, %43, %c0_i32_37 : i32
    %77 = arith.extui %76 : i1 to i32
    %c0_i32_38 = arith.constant 0 : i32
    %78 = arith.cmpi ne, %77, %c0_i32_38 : i32
    scf.if %78 {
      %154 = arith.subf %59, %22 : vector<8x128xf32>
      %155 = math.absf %154 : vector<8x128xf32>
      %c0_80 = arith.constant 0 : index
      %c0_81 = arith.constant 0 : index
      %c0_82 = arith.constant 0 : index
      %156 = vector.load %arg6[%c0_80, %c0_81, %c0_82] : memref<1x1x128xf32, #tpu.memory_space<vmem>>, vector<1x1x128xf32>
      %157 = vector.shape_cast %156 : vector<1x1x128xf32> to vector<1x128xf32>
      %cst_83 = arith.constant dense<0.000000e+00> : vector<128xf32>
      %158 = vector.multi_reduction <add>, %155, %cst_83 [0] : vector<8x128xf32> to vector<128xf32>
      %159 = vector.shape_cast %158 : vector<128xf32> to vector<1x128xf32>
      %160 = arith.addf %157, %159 : vector<1x128xf32>
      %c0_84 = arith.constant 0 : index
      %c0_85 = arith.constant 0 : index
      %c0_86 = arith.constant 0 : index
      %161 = vector.load %arg6[%c0_84, %c0_85, %c0_86] : memref<1x1x128xf32, #tpu.memory_space<vmem>>, vector<1x1x128xf32>
      %162 = vector.shape_cast %161 : vector<1x1x128xf32> to vector<1x128xf32>
      %163 = vector.shape_cast %160 : vector<1x128xf32> to vector<1x1x128xf32>
      tpu.vector_store %arg6[%c0_84, %c0_85, %c0_86], %163 {strides = array<i32>} : memref<1x1x128xf32, #tpu.memory_space<vmem>>, vector<1x1x128xf32>,
    } else {
    }
    %c2_i32 = arith.constant 2 : i32
    %c4_i32_39 = arith.constant 4 : i32
    %79 = arith.muli %arg2, %c4_i32_39 : i32
    %80 = arith.addi %79, %c2_i32 : i32
    %c0_40 = arith.constant 0 : index
    %81 = arith.index_cast %c2_i32 : i32 to index
    %c0_41 = arith.constant 0 : index
    %c0_42 = arith.constant 0 : index
    %82 = vector.load %arg3[%c0_40, %81, %c0_41, %c0_42] : memref<1x4x8x128xf32, #tpu.memory_space<vmem>>, vector<1x1x8x128xf32>
    %83 = vector.shape_cast %82 : vector<1x1x8x128xf32> to vector<8x128xf32>
    %c0_43 = arith.constant 0 : index
    %84 = arith.index_cast %c2_i32 : i32 to index
    %c0_44 = arith.constant 0 : index
    %c0_45 = arith.constant 0 : index
    %85 = vector.load %arg4[%c0_43, %84, %c0_44, %c0_45] : memref<1x4x1x128xi32, #tpu.memory_space<vmem>>, vector<1x1x1x128xi32>
    %86 = vector.shape_cast %85 : vector<1x1x1x128xi32> to vector<1x128xi32>
    %cst_46 = arith.constant dense<0xFF800000> : vector<128xf32>
    %87 = vector.multi_reduction <maximumf>, %83, %cst_46 [0] : vector<8x128xf32> to vector<128xf32>
    %88 = vector.shape_cast %87 : vector<128xf32> to vector<1x128xf32>
    %89 = vector.broadcast %88 : vector<1x128xf32> to vector<8x128xf32>
    %90 = arith.subf %83, %89 : vector<8x128xf32>
    %91 = math.exp %90 : vector<8x128xf32>
    %cst_47 = arith.constant dense<0.000000e+00> : vector<128xf32>
    %92 = vector.multi_reduction <add>, %91, %cst_47 [0] : vector<8x128xf32> to vector<128xf32>
    %93 = vector.shape_cast %92 : vector<128xf32> to vector<1x128xf32>
    %94 = tpu.reciprocal %93 {approx = true} : vector<1x128xf32> -> vector<1x128xf32>
    %95 = vector.broadcast %94 : vector<1x128xf32> to vector<8x128xf32>
    %96 = arith.mulf %91, %95 : vector<8x128xf32>
    %97 = math.log %93 : vector<1x128xf32>
    %98 = arith.addf %88, %97 : vector<1x128xf32>
    %99 = vector.broadcast %86 : vector<1x128xi32> to vector<8x128xi32>
    %100 = arith.cmpi eq, %3, %99 : vector<8x128xi32>
    %101 = vector.broadcast %98 : vector<1x128xf32> to vector<8x128xf32>
    %102 = arith.subf %101, %83 : vector<8x128xf32>
    %cst_48 = arith.constant 0.000000e+00 : f32
    %103 = vector.broadcast %cst_48 : f32 to vector<8x128xf32>
    %104 = arith.select %100, %102, %103 : vector<8x128xi1>, vector<8x128xf32>
    %c0_49 = arith.constant 0 : index
    %c0_50 = arith.constant 0 : index
    %c0_51 = arith.constant 0 : index
    %105 = vector.load %arg5[%c0_49, %c0_50, %c0_51] : memref<1x1x128xf32, #tpu.memory_space<vmem>>, vector<1x1x128xf32>
    %106 = vector.shape_cast %105 : vector<1x1x128xf32> to vector<1x128xf32>
    %cst_52 = arith.constant dense<0.000000e+00> : vector<128xf32>
    %107 = vector.multi_reduction <add>, %104, %cst_52 [0] : vector<8x128xf32> to vector<128xf32>
    %108 = vector.shape_cast %107 : vector<128xf32> to vector<1x128xf32>
    %109 = arith.addf %106, %108 : vector<1x128xf32>
    %c0_53 = arith.constant 0 : index
    %c0_54 = arith.constant 0 : index
    %c0_55 = arith.constant 0 : index
    %110 = vector.load %arg5[%c0_53, %c0_54, %c0_55] : memref<1x1x128xf32, #tpu.memory_space<vmem>>, vector<1x1x128xf32>
    %111 = vector.shape_cast %110 : vector<1x1x128xf32> to vector<1x128xf32>
    %112 = vector.shape_cast %109 : vector<1x128xf32> to vector<1x1x128xf32>
    tpu.vector_store %arg5[%c0_53, %c0_54, %c0_55], %112 {strides = array<i32>} : memref<1x1x128xf32, #tpu.memory_space<vmem>>, vector<1x1x128xf32>,
    %c0_i32_56 = arith.constant 0 : i32
    %113 = arith.cmpi sgt, %80, %c0_i32_56 : i32
    %114 = arith.extui %113 : i1 to i32
    %c0_i32_57 = arith.constant 0 : i32
    %115 = arith.cmpi ne, %114, %c0_i32_57 : i32
    scf.if %115 {
      %154 = arith.subf %96, %59 : vector<8x128xf32>
      %155 = math.absf %154 : vector<8x128xf32>
      %c0_80 = arith.constant 0 : index
      %c0_81 = arith.constant 0 : index
      %c0_82 = arith.constant 0 : index
      %156 = vector.load %arg6[%c0_80, %c0_81, %c0_82] : memref<1x1x128xf32, #tpu.memory_space<vmem>>, vector<1x1x128xf32>
      %157 = vector.shape_cast %156 : vector<1x1x128xf32> to vector<1x128xf32>
      %cst_83 = arith.constant dense<0.000000e+00> : vector<128xf32>
      %158 = vector.multi_reduction <add>, %155, %cst_83 [0] : vector<8x128xf32> to vector<128xf32>
      %159 = vector.shape_cast %158 : vector<128xf32> to vector<1x128xf32>
      %160 = arith.addf %157, %159 : vector<1x128xf32>
      %c0_84 = arith.constant 0 : index
      %c0_85 = arith.constant 0 : index
      %c0_86 = arith.constant 0 : index
      %161 = vector.load %arg6[%c0_84, %c0_85, %c0_86] : memref<1x1x128xf32, #tpu.memory_space<vmem>>, vector<1x1x128xf32>
      %162 = vector.shape_cast %161 : vector<1x1x128xf32> to vector<1x128xf32>
      %163 = vector.shape_cast %160 : vector<1x128xf32> to vector<1x1x128xf32>
      tpu.vector_store %arg6[%c0_84, %c0_85, %c0_86], %163 {strides = array<i32>} : memref<1x1x128xf32, #tpu.memory_space<vmem>>, vector<1x1x128xf32>,
    } else {
    }
    %c3_i32 = arith.constant 3 : i32
    %c4_i32_58 = arith.constant 4 : i32
    %116 = arith.muli %arg2, %c4_i32_58 : i32
    %117 = arith.addi %116, %c3_i32 : i32
    %c0_59 = arith.constant 0 : index
    %118 = arith.index_cast %c3_i32 : i32 to index
    %c0_60 = arith.constant 0 : index
    %c0_61 = arith.constant 0 : index
    %119 = vector.load %arg3[%c0_59, %118, %c0_60, %c0_61] : memref<1x4x8x128xf32, #tpu.memory_space<vmem>>, vector<1x1x8x128xf32>
    %120 = vector.shape_cast %119 : vector<1x1x8x128xf32> to vector<8x128xf32>
    %c0_62 = arith.constant 0 : index
    %121 = arith.index_cast %c3_i32 : i32 to index
    %c0_63 = arith.constant 0 : index
    %c0_64 = arith.constant 0 : index
    %122 = vector.load %arg4[%c0_62, %121, %c0_63, %c0_64] : memref<1x4x1x128xi32, #tpu.memory_space<vmem>>, vector<1x1x1x128xi32>
    %123 = vector.shape_cast %122 : vector<1x1x1x128xi32> to vector<1x128xi32>
    %cst_65 = arith.constant dense<0xFF800000> : vector<128xf32>
    %124 = vector.multi_reduction <maximumf>, %120, %cst_65 [0] : vector<8x128xf32> to vector<128xf32>
    %125 = vector.shape_cast %124 : vector<128xf32> to vector<1x128xf32>
    %126 = vector.broadcast %125 : vector<1x128xf32> to vector<8x128xf32>
    %127 = arith.subf %120, %126 : vector<8x128xf32>
    %128 = math.exp %127 : vector<8x128xf32>
    %cst_66 = arith.constant dense<0.000000e+00> : vector<128xf32>
    %129 = vector.multi_reduction <add>, %128, %cst_66 [0] : vector<8x128xf32> to vector<128xf32>
    %130 = vector.shape_cast %129 : vector<128xf32> to vector<1x128xf32>
    %131 = tpu.reciprocal %130 {approx = true} : vector<1x128xf32> -> vector<1x128xf32>
    %132 = vector.broadcast %131 : vector<1x128xf32> to vector<8x128xf32>
    %133 = arith.mulf %128, %132 : vector<8x128xf32>
    %134 = math.log %130 : vector<1x128xf32>
    %135 = arith.addf %125, %134 : vector<1x128xf32>
    %136 = vector.broadcast %123 : vector<1x128xi32> to vector<8x128xi32>
    %137 = arith.cmpi eq, %3, %136 : vector<8x128xi32>
    %138 = vector.broadcast %135 : vector<1x128xf32> to vector<8x128xf32>
    %139 = arith.subf %138, %120 : vector<8x128xf32>
    %cst_67 = arith.constant 0.000000e+00 : f32
    %140 = vector.broadcast %cst_67 : f32 to vector<8x128xf32>
    %141 = arith.select %137, %139, %140 : vector<8x128xi1>, vector<8x128xf32>
    %c0_68 = arith.constant 0 : index
    %c0_69 = arith.constant 0 : index
    %c0_70 = arith.constant 0 : index
    %142 = vector.load %arg5[%c0_68, %c0_69, %c0_70] : memref<1x1x128xf32, #tpu.memory_space<vmem>>, vector<1x1x128xf32>
    %143 = vector.shape_cast %142 : vector<1x1x128xf32> to vector<1x128xf32>
    %cst_71 = arith.constant dense<0.000000e+00> : vector<128xf32>
    %144 = vector.multi_reduction <add>, %141, %cst_71 [0] : vector<8x128xf32> to vector<128xf32>
    %145 = vector.shape_cast %144 : vector<128xf32> to vector<1x128xf32>
    %146 = arith.addf %143, %145 : vector<1x128xf32>
    %c0_72 = arith.constant 0 : index
    %c0_73 = arith.constant 0 : index
    %c0_74 = arith.constant 0 : index
    %147 = vector.load %arg5[%c0_72, %c0_73, %c0_74] : memref<1x1x128xf32, #tpu.memory_space<vmem>>, vector<1x1x128xf32>
    %148 = vector.shape_cast %147 : vector<1x1x128xf32> to vector<1x128xf32>
    %149 = vector.shape_cast %146 : vector<1x128xf32> to vector<1x1x128xf32>
    tpu.vector_store %arg5[%c0_72, %c0_73, %c0_74], %149 {strides = array<i32>} : memref<1x1x128xf32, #tpu.memory_space<vmem>>, vector<1x1x128xf32>,
    %c0_i32_75 = arith.constant 0 : i32
    %150 = arith.cmpi sgt, %117, %c0_i32_75 : i32
    %151 = arith.extui %150 : i1 to i32
    %c0_i32_76 = arith.constant 0 : i32
    %152 = arith.cmpi ne, %151, %c0_i32_76 : i32
    scf.if %152 {
      %154 = arith.subf %133, %96 : vector<8x128xf32>
      %155 = math.absf %154 : vector<8x128xf32>
      %c0_80 = arith.constant 0 : index
      %c0_81 = arith.constant 0 : index
      %c0_82 = arith.constant 0 : index
      %156 = vector.load %arg6[%c0_80, %c0_81, %c0_82] : memref<1x1x128xf32, #tpu.memory_space<vmem>>, vector<1x1x128xf32>
      %157 = vector.shape_cast %156 : vector<1x1x128xf32> to vector<1x128xf32>
      %cst_83 = arith.constant dense<0.000000e+00> : vector<128xf32>
      %158 = vector.multi_reduction <add>, %155, %cst_83 [0] : vector<8x128xf32> to vector<128xf32>
      %159 = vector.shape_cast %158 : vector<128xf32> to vector<1x128xf32>
      %160 = arith.addf %157, %159 : vector<1x128xf32>
      %c0_84 = arith.constant 0 : index
      %c0_85 = arith.constant 0 : index
      %c0_86 = arith.constant 0 : index
      %161 = vector.load %arg6[%c0_84, %c0_85, %c0_86] : memref<1x1x128xf32, #tpu.memory_space<vmem>>, vector<1x1x128xf32>
      %162 = vector.shape_cast %161 : vector<1x1x128xf32> to vector<1x128xf32>
      %163 = vector.shape_cast %160 : vector<1x128xf32> to vector<1x1x128xf32>
      tpu.vector_store %arg6[%c0_84, %c0_85, %c0_86], %163 {strides = array<i32>} : memref<1x1x128xf32, #tpu.memory_space<vmem>>, vector<1x1x128xf32>,
    } else {
    }
    %c4_i32_77 = arith.constant 4 : i32
    %c0_78 = arith.constant 0 : index
    %c0_79 = arith.constant 0 : index
    %153 = vector.load %arg7[%c0_78, %c0_79] : memref<8x128xf32, #tpu.memory_space<vmem>>, vector<8x128xf32>
    tpu.vector_store %arg7[%c0_78, %c0_79], %133 {strides = array<i32>} : memref<8x128xf32, #tpu.memory_space<vmem>>, vector<8x128xf32>,
    return
  }
  func.func @transform_0(%arg0: i32, %arg1: i32, %arg2: i32) -> (i32, i32, i32, i32) {
    %c0_i32 = arith.constant 0 : i32
    %c0_i32_0 = arith.constant 0 : i32
    return %arg0, %arg2, %c0_i32, %arg1 : i32, i32, i32, i32
  }
  func.func @transform_1(%arg0: i32, %arg1: i32, %arg2: i32) -> (i32, i32, i32, i32) {
    %c0_i32 = arith.constant 0 : i32
    %c0_i32_0 = arith.constant 0 : i32
    return %arg0, %arg2, %c0_i32, %arg1 : i32, i32, i32, i32
  }
  func.func @transform_2(%arg0: i32, %arg1: i32, %arg2: i32) -> (i32, i32, i32) {
    %c0_i32 = arith.constant 0 : i32
    %c0_i32_0 = arith.constant 0 : i32
    return %arg0, %c0_i32, %arg1 : i32, i32, i32
  }
  func.func @transform_3(%arg0: i32, %arg1: i32, %arg2: i32) -> (i32, i32, i32) {
    %c0_i32 = arith.constant 0 : i32
    %c0_i32_0 = arith.constant 0 : i32
    return %arg0, %c0_i32, %arg1 : i32, i32, i32
  }
}

</mosaic_0001>

<bundles_post_ra>
// kernel: cont_loss_forward.1
= control target key start
LH: loop header
LB: loop body
LE: loop exit
PB: predicated region body
PF: predicated region fallthrough
CT: control target
= control target key end

     0   :  { %s759_s12 = smov 0   ;;  %s761_s13 = smov 0   ;;  %s876_s0 = inlined_call_operand.vmem [shape: f32[2,4,8,128], index: 0, kind: input, shape index: {}]   ;;  %s877_s1 = inlined_call_operand.vmem [shape: s32[2,4,1,128], index: 1, kind: input, shape index: {}]   ;;  %s878_s2 = inlined_call_operand.vmem [shape: f32[2,1,128], index: 2, kind: output, shape index: {0}]   ;;  %s879_s3 = inlined_call_operand.vmem [shape: f32[2,1,128], index: 3, kind: output, shape index: {1}]  }
   0x1   :  { %s763_s14 = smov 0  }
   0x2 LB: > { %s33_s15 = sadd.s32 1, %s732_s13  ;;  %p648_p0 = scmp.ge.s32.totalorder %s736_s14, 1  ;;  %s736_s14 = sphi %s763_s14, %s14_s14   ;;  %s732_s13 = sphi %s761_s13, %s881_s13   ;;  %s728_s12 = sphi %s759_s12, %s880_s12  }
   0x3   : > { %p35_p1 = scmp.ge.s32.totalorder %s33_s15, 2  ;;  %p196_p2 = scmp.lt.s32.totalorder %s736_s14, 3 }
   0x5   : > { %s883_s15 = smov (%p35_p1, %s33_s15), 0  ;;  %p197_p3 = pnand %p648_p0, %p196_p2 }
   0x6   : > { %p246_p4 = scmp.lt.s32.totalorder (!%p197_p3), %s728_s12, 1  ;;  %v738_v0 = vmov (!%p197_p3), 0.0  }
   0x7   : > { %200 = sbr.rel (%p197_p3) target bundleno = 122 (0x7a), region = 28 }
   0xe   : > { %s885_s12 = smov (!%p246_p4, %s728_s12), 1 }
   0xf   : > { %s783_s18 = scalar_lea.vmem %s878_s2, %s885_s12  ;;  %s789_s21 = scalar_lea.vmem %s879_s3, %s885_s12 }
  0x10   : > { %286 = vst [vmem:[%s783_s18] sm:$0x1] %v738_v0  ;;  %287 = vst [vmem:[%s789_s21] sm:$0x1] %v738_v0  ;;  %s664_s22 = sshll.u32 %s885_s12, 5  ;;  %s651_s26 = sshll.u32 %s885_s12, 2 }
  0x11   : > { %s256_s25 = scalar_lea.vmem %s876_s0, %s664_s22  ;;  %s833_s29 = scalar_lea.vmem %s877_s1, %s651_s26 }
  0x12   : > { %v797_v1 = vld [vmem:[%s256_s25] sm:$0xff]  ;;  %v799_v2 = vld [vmem:[%s256_s25 + $0x8] sm:$0xff]  ;;  %v803_v5 = vld [vmem:[%s256_s25 + $0x10] sm:$0xff] }
  0x13   : > { %v294_v3 = vrot.slane %v797_v1, 4  ;;  %v350_v4 = vrot.slane %v799_v2, 4  ;;  %v805_v6 = vld [vmem:[%s256_s25 + $0x18] sm:$0xff]  ;;  %v406_v7 = vrot.slane %v803_v5, 4 }
  0x14   : > { %v462_v8 = vrot.slane %v805_v6, 4 }
  0x15   : > { %v295_v9 = vmax.f32 %v797_v1, %v294_v3  ;;  %v351_v10 = vmax.f32 %v799_v2, %v350_v4  ;;  %v407_v11 = vmax.f32 %v803_v5, %v406_v7  ;;  %v288_v3 = vlaneseq }
  0x16   : > { %v463_v12 = vmax.f32 %v805_v6, %v462_v8 }
  0x17   : > { %v296_v13 = vrot.slane %v295_v9, 2  ;;  %v352_v14 = vrot.slane %v351_v10, 2  ;;  %v408_v15 = vrot.slane %v407_v11, 2  ;;  %v835_v8 = vshrl.u32 %v288_v3, 7 }
  0x18   : > { %v464_v16 = vrot.slane %v463_v12, 2 }
  0x19   : > { %v297_v17 = vmax.f32 %v295_v9, %v296_v13  ;;  %v353_v18 = vmax.f32 %v351_v10, %v352_v14  ;;  %v409_v19 = vmax.f32 %v407_v11, %v408_v15  ;;  %v652_v10 = vld [vmem:[%s833_s29] ss:$0 sm:$0xff]  ;;  %v655_v14 = vld [vmem:[%s833_s29 + $0x1] ss:$0 sm:$0xff] }
  0x1a   : > { %v465_v20 = vmax.f32 %v463_v12, %v464_v16  ;;  %vm318_vm0 = vcmp.eq.s32.totalorder %v835_v8, %v652_v10  ;;  %vm374_vm1 = vcmp.eq.s32.totalorder %v835_v8, %v655_v14 }
  0x1b   : > { %v298_v21 = vrot.slane %v297_v17, 1  ;;  %v354_v22 = vrot.slane %v353_v18, 1  ;;  %v410_v23 = vrot.slane %v409_v19, 1 }
  0x1c   : > { %v466_v24 = vrot.slane %v465_v20, 1 }
  0x1d   : > { %v813_v25 = vmax.f32 %v297_v17, %v298_v21  ;;  %v815_v26 = vmax.f32 %v353_v18, %v354_v22  ;;  %v817_v27 = vmax.f32 %v409_v19, %v410_v23 }
  0x1e   : > { %v819_v28 = vmax.f32 %v465_v20, %v466_v24 }
  0x1f   : > { %v300_v29 = vsub.f32 %v797_v1, %v813_v25  ;;  %v356_v30 = vsub.f32 %v799_v2, %v815_v26  ;;  %v412_v31 = vsub.f32 %v803_v5, %v817_v27 }
  0x20   : > { %v468_v32 = vsub.f32 %v805_v6, %v819_v28 }
  0x21   : > { %v301_v33 = vmul.f32 1.442695, %v300_v29  ;;  %v357_v34 = vmul.f32 1.442695, %v356_v30  ;;  %v413_v35 = vmul.f32 1.442695, %v412_v31 }
  0x22   : > { %v469_v36 = vmul.f32 1.442695, %v468_v32 }
  0x23   : > { %690 = vpow2.f32 %v301_v33  ;;  %v658_v33 = vld [vmem:[%s833_s29 + $0x2] ss:$0 sm:$0xff] }
  0x24   : > { %692 = vpow2.f32 %v357_v34  ;;  %vm430_vm2 = vcmp.eq.s32.totalorder %v835_v8, %v658_v33 }
  0x25   : > { %694 = vpow2.f32 %v413_v35 }
  0x26   : > { %696 = vpow2.f32 %v469_v36 }
  0x2d   : > { %v691_v37 = vpop.eup %690 }
  0x2e   : > { %v693_v38 = vpop.eup %692  ;;  %v303_v39 = vrot.slane %v691_v37, 4 }
  0x2f   : > { %v695_v40 = vpop.eup %694  ;;  %v359_v41 = vrot.slane %v693_v38, 4 }
  0x30   : > { %v697_v42 = vpop.eup %696  ;;  %v304_v43 = vadd.f32 %v691_v37, %v303_v39  ;;  %v415_v44 = vrot.slane %v695_v40, 4 }
  0x31   : > { %v360_v45 = vadd.f32 %v693_v38, %v359_v41  ;;  %v471_v46 = vrot.slane %v697_v42, 4 }
  0x32   : > { %v305_v47 = vrot.slane %v304_v43, 2  ;;  %v416_v48 = vadd.f32 %v695_v40, %v415_v44 }
  0x33   : > { %v361_v49 = vrot.slane %v360_v45, 2  ;;  %v472_v50 = vadd.f32 %v697_v42, %v471_v46 }
  0x34   : > { %v306_v51 = vadd.f32 %v305_v47, %v304_v43  ;;  %v417_v52 = vrot.slane %v416_v48, 2 }
  0x35   : > { %v362_v53 = vadd.f32 %v361_v49, %v360_v45  ;;  %v473_v54 = vrot.slane %v472_v50, 2 }
  0x36   : > { %v307_v55 = vrot.slane %v306_v51, 1  ;;  %v418_v56 = vadd.f32 %v417_v52, %v416_v48 }
  0x37   : > { %v363_v57 = vrot.slane %v362_v53, 1  ;;  %v474_v58 = vadd.f32 %v473_v54, %v472_v50 }
  0x38   : > { %v308_v59 = vadd.f32 %v307_v55, %v306_v51  ;;  %v419_v60 = vrot.slane %v418_v56, 1 }
  0x39   : > { %v364_v61 = vadd.f32 %v363_v57, %v362_v53  ;;  %v475_v62 = vrot.slane %v474_v58, 1 }
  0x3a   : > { %698 = vrcp.f32 %v308_v59  ;;  %v420_v63 = vadd.f32 %v419_v60, %v418_v56  ;;  %v321_v56 = vld [vmem:[%s783_s18] sm:$0x1] }
  0x3b   : > { %700 = vlog2.f32 %v308_v59  ;;  %v476_v0 = vadd.f32 %v475_v62, %v474_v58  ;;  %v661_v58 = vld [vmem:[%s833_s29 + $0x3] ss:$0 sm:$0xff]  ;;  %v392_v62 = vld [vmem:[%s789_s21] sm:$0x1] }
  0x3c   : > { %702 = vlog2.f32 %v364_v61  ;;  %vm486_vm3 = vcmp.eq.s32.totalorder %v835_v8, %v661_v58 }
  0x3d   : > { %704 = vrcp.f32 %v364_v61 }
  0x3e   : > { %706 = vlog2.f32 %v420_v63 }
  0x3f   : > { %708 = vrcp.f32 %v420_v63 }
  0x40   : > { %710 = vrcp.f32 %v476_v0 }
  0x41   : > { %712 = vlog2.f32 %v476_v0 }
  0x44   : > { %v699_v4 = vpop.eup %698 }
  0x45   : > { %v701_v7 = vpop.eup %700  ;;  %v310_v12 = vmul.f32 %v699_v4, %v691_v37 }
  0x46   : > { %v703_v9 = vpop.eup %702  ;;  %v312_v11 = vmul.f32 0.6931472, %v701_v7 }
  0x47   : > { %v705_v13 = vpop.eup %704  ;;  %v368_v15 = vmul.f32 0.6931472, %v703_v9 }
  0x48   : > { %v707_v16 = vpop.eup %706  ;;  %v313_v17 = vadd.f32 %v312_v11, %v813_v25  ;;  %v366_v18 = vmul.f32 %v705_v13, %v693_v38 }
  0x49   : > { %v709_v19 = vpop.eup %708  ;;  %v369_v20 = vadd.f32 %v368_v15, %v815_v26  ;;  %v424_v21 = vmul.f32 0.6931472, %v707_v16 }
  0x4a   : > { %v319_v22 = vsub.f32 %v313_v17, %v797_v1  ;;  %v390_v23 = vsub.f32 %v366_v18, %v310_v12  ;;  %v422_v24 = vmul.f32 %v709_v19, %v695_v40  ;;  %v711_v29 = vpop.eup %710 }
  0x4b   : > { %v375_v30 = vsub.f32 %v369_v20, %v799_v2  ;;  %v425_v31 = vadd.f32 %v424_v21, %v817_v27  ;;  %v478_v35 = vmul.f32 %v711_v29, %v697_v42  ;;  %v713_v36 = vpop.eup %712 }
  0x4c   : > { %v320_v32 = vsel %vm318_vm0, %v319_v22, 0.0  ;;  %v391_v25 = vand.u32 2147483647, %v390_v23  ;;  %v446_v34 = vsub.f32 %v422_v24, %v366_v18  ;;  %v480_v45 = vmul.f32 0.6931472, %v713_v36 }
  0x4d   : > { %v322_v37 = vrot.slane %v320_v32, 4  ;;  %v376_v26 = vsel %vm374_vm1, %v375_v30, 0.0  ;;  %v431_v38 = vsub.f32 %v425_v31, %v803_v5  ;;  %v502_v43 = vsub.f32 %v478_v35, %v422_v24 }
  0x4e   : > { %v378_v1 = vrot.slane %v376_v26, 4  ;;  %v393_v39 = vrot.slane %v391_v25, 4  ;;  %v447_v41 = vand.u32 2147483647, %v446_v34  ;;  %v481_v53 = vadd.f32 %v480_v45, %v819_v28 }
  0x4f   : > { %v323_v40 = vadd.f32 %v322_v37, %v320_v32  ;;  %v432_v47 = vsel %vm430_vm2, %v431_v38, 0.0  ;;  %v503_v49 = vand.u32 2147483647, %v502_v43 }
  0x50   : > { %v379_v2 = vadd.f32 %v378_v1, %v376_v26  ;;  %v394_v27 = vadd.f32 %v393_v39, %v391_v25  ;;  %v449_v44 = vrot.slane %v447_v41, 4  ;;  %v434_v55 = vrot.slane %v432_v47, 4 }
  0x51   : > { %v324_v46 = vrot.slane %v323_v40, 2  ;;  %v505_v59 = vrot.slane %v503_v49, 4  ;;  %v487_v3 = vsub.f32 %v481_v53, %v805_v6 }
  0x52   : > { %v395_v42 = vrot.slane %v394_v27, 2  ;;  %v450_v48 = vadd.f32 %v449_v44, %v447_v41  ;;  %v380_v50 = vrot.slane %v379_v2, 2  ;;  %v435_v7 = vadd.f32 %v434_v55, %v432_v47 }
  0x53   : > { %v325_v5 = vadd.f32 %v324_v46, %v323_v40  ;;  %v506_v9 = vadd.f32 %v505_v59, %v503_v49  ;;  %v488_v12 = vsel %vm486_vm3, %v487_v3, 0.0 }
  0x54   : > { %v396_v51 = vadd.f32 %v395_v42, %v394_v27  ;;  %v451_v52 = vrot.slane %v450_v48, 2  ;;  %v381_v61 = vadd.f32 %v380_v50, %v379_v2  ;;  %v436_v13 = vrot.slane %v435_v7, 2 }
  0x55   : > { %v326_v54 = vrot.slane %v325_v5, 1  ;;  %v507_v14 = vrot.slane %v506_v9, 2  ;;  %v490_v16 = vrot.slane %v488_v12, 4 }
  0x56   : > { %v397_v57 = vrot.slane %v396_v51, 1  ;;  %v452_v0 = vadd.f32 %v451_v52, %v450_v48  ;;  %v382_v10 = vrot.slane %v381_v61, 1  ;;  %v437_v17 = vadd.f32 %v436_v13, %v435_v7 }
  0x57   : > { %v327_v60 = vadd.f32 %v326_v54, %v325_v5  ;;  %v508_v8 = vadd.f32 %v507_v14, %v506_v9  ;;  %v491_v21 = vadd.f32 %v490_v16, %v488_v12 }
  0x58   : > { %v398_v63 = vadd.f32 %v397_v57, %v396_v51  ;;  %v453_v11 = vrot.slane %v452_v0, 1  ;;  %v383_v15 = vadd.f32 %v382_v10, %v381_v61  ;;  %v438_v23 = vrot.slane %v437_v17, 1 }
  0x59   : > { %v328_v4 = vadd.f32 %v327_v60, %v321_v56  ;;  %v509_v24 = vrot.slane %v508_v8, 1  ;;  %v492_v29 = vrot.slane %v491_v21, 2 }
  0x5a   : > { %v399_v28 = vadd.f32 %v398_v63, %v392_v62  ;;  %v454_v6 = vadd.f32 %v453_v11, %v452_v0  ;;  %v439_v30 = vadd.f32 %v438_v23, %v437_v17 }
  0x5b   : > { %329 = vst [vmem:[%s783_s18] sm:$0x1] %v328_v4  ;;  %v510_v31 = vadd.f32 %v509_v24, %v508_v8  ;;  %v493_v32 = vadd.f32 %v492_v29, %v491_v21 }
  0x5c   : > { %400 = vst [vmem:[%s789_s21] sm:$0x1] %v399_v28 }
  0x5d   : > { %v494_v36 = vrot.slane %v493_v32, 1 }
  0x5f   : > { %v495_v37 = vadd.f32 %v494_v36, %v493_v32 }
  0x62   : > { %v377_v18 = vld [vmem:[%s783_s18] sm:$0x1] }
  0x63   : > { %v384_v19 = vadd.f32 %v383_v15, %v377_v18  ;;  %v448_v20 = vld [vmem:[%s789_s21] sm:$0x1] }
  0x64   : > { %v455_v22 = vadd.f32 %v454_v6, %v448_v20 }
  0x65   : > { %385 = vst [vmem:[%s783_s18] sm:$0x1] %v384_v19 }
  0x66   : > { %456 = vst [vmem:[%s789_s21] sm:$0x1] %v455_v22 }
  0x6c   : > { %v433_v25 = vld [vmem:[%s783_s18] sm:$0x1] }
  0x6d   : > { %v440_v33 = vadd.f32 %v439_v30, %v433_v25  ;;  %v504_v34 = vld [vmem:[%s789_s21] sm:$0x1] }
  0x6e   : > { %v511_v35 = vadd.f32 %v510_v31, %v504_v34 }
  0x6f   : > { %441 = vst [vmem:[%s783_s18] sm:$0x1] %v440_v33 }
  0x70   : > { %512 = vst [vmem:[%s789_s21] sm:$0x1] %v511_v35 }
  0x76   : > { %v489_v26 = vld [vmem:[%s783_s18] sm:$0x1] }
  0x77   : > { %v496_v38 = vadd.f32 %v495_v37, %v489_v26 }
  0x79   : > { %497 = vst [vmem:[%s783_s18] sm:$0x1] %v496_v38 }
  0x7a PF: > { %s14_s14 = sadd.s32 1, %s736_s14   ;;  %s880_s12 = smov %s732_s13 }
  0x7b   : > { %p11_p5 = scmp.ge.s32.totalorder %s14_s14, 4   ;;  %s881_s13 = smov %s883_s15 }
  0x7d   :  { %13 = sbr.rel (!%p11_p5) target bundleno = 2 (0x2), region = 99 }

</bundles_post_ra>
